<compile_context>
chip_gen: v7x
topology: tpu7x:2x2x1
jax: 0.10.0
libtpu: 0.0.40
codegen_flags: <defaults>
</compile_context>

<pallas_src>
import math

import jax
import jax.numpy as jnp
from jax.experimental import pallas as pl
from jax.experimental.pallas import tpu as pltpu

IGNORE_INDEX = -100

_TARGET_LOGIT_BYTES_PER_STEP = 4 * 1024 * 1024   # ~4 MiB of logits per step


def _vmem_budget():
    """Generation-aware (input budget, compiler vmem limit) in bytes."""
    try:
        cap = int(getattr(pltpu.get_tpu_info(), "vmem_capacity_bytes",
                          64 * 1024 * 1024))
    except Exception:                      # non-TPU / query failure fallback
        cap = 64 * 1024 * 1024
    if cap >= 96 * 1024 * 1024:            # v5e / v6e: 128 MiB physical VMEM
        return 48 * 1024 * 1024, 80 * 1024 * 1024
    return 24 * 1024 * 1024, 44 * 1024 * 1024   # v7x: 64 MiB per TensorCore


def _pick_tile_rows(c, w, itemsize, h, max_tile_rows=None):
    """Rows per block: large enough to amortize grid/DMA overhead, small
    enough that double-buffered inputs *plus* the f32 temporaries fit VMEM."""
    input_budget, vmem_limit = _vmem_budget()
    row_logit = c * w * itemsize                     # one row of logits (HBM)
    # VMEM per row: double-buffered logits + int32 targets, live f32
    # temporaries of the exp pass (upcast copy + exp result), small extras.
    row_vmem = 2 * (row_logit + 4 * w) + 2 * c * w * 4 + 8 * w
    t = min(max(8, _TARGET_LOGIT_BYTES_PER_STEP // max(row_logit, 1)),
            max(8, input_budget // max(row_vmem, 1)))
    if max_tile_rows is not None:
        t = min(t, max_tile_rows)
    if t >= h:
        return h, vmem_limit
    t = max(8, (t // 8) * 8)                 # multiple of 8, or == full h
    return int(min(t, h)), vmem_limit


def _view_5d(logits):
    """View logits as (N, C, P, ROWS, W) without relayout of the big tensor.

    The last two dims of the native shape are preserved; leading spatial dims
    are merged into ROWS only when that merge is a bitcast for this dtype's
    sublane tiling (8 rows for 32-bit, 16 for bf16, 32 for 8-bit)."""
    n, c = logits.shape[0], logits.shape[1]
    s = logits.shape[2:]
    itemsize = jnp.dtype(logits.dtype).itemsize
    row_tile = 8 * max(1, 4 // itemsize)
    if len(s) == 0:
        p, h, w = 1, 1, 1
    elif len(s) == 1:
        # TODO(synk): 1-D spatial incurs one small relayout to keep C off the
        # sublane axis; uncommon for this segmentation loss.
        p, h, w = 1, 1, s[0]
    elif len(s) == 2 or s[-2] % row_tile == 0:
        p, h, w = 1, math.prod(s[:-1]), s[-1]        # bitcast merge
    else:
        p, h, w = math.prod(s[:-2]), s[-2], s[-1]    # always a bitcast
    return logits.reshape(n, c, p, h, w), (n, c, p, h, w)


def _make_kernel(h, tile_rows):
    """Kernel over one (C, tile_rows, W) logits block of one (n, p) slab."""
    ragged = (h % tile_rows) != 0

    def kernel(x_ref, t_ref, sum_ref, cnt_ref):
        x = x_ref[...]                               # (C, rows, W) native dt
        t = t_ref[...]                               # (rows, W) int32

        valid = t != IGNORE_INDEX
        if ragged:
            row = (pl.program_id(2) * tile_rows
                   + jax.lax.broadcasted_iota(jnp.int32, t.shape, 0))
            valid = jnp.logical_and(valid, row < h)

        # Class-axis max and one-hot target gather in the native dtype
        # (exact: max never rounds; the gather sums exactly one element).
        m = jnp.max(x, axis=0)                                   # (rows, W)
        cls = jax.lax.broadcasted_iota(jnp.int32, x.shape, 0)    # (C, rows, W)
        tgt = jnp.sum(jnp.where(cls == t[None], x, 0), axis=0)   # (rows, W)

        # exp / log in f32 for numerical stability.
        mf = m.astype(jnp.float32)
        e = jnp.exp(x.astype(jnp.float32) - mf[None])
        lse = jnp.log(jnp.sum(e, axis=0)) + mf                   # (rows, W)
        loss = jnp.where(valid, lse - tgt.astype(jnp.float32), 0.0)

        # Per-step partial outputs (no carried accumulator -> fully parallel
        # grid; final reduction happens in the JAX epilogue).
        sum_ref[...] = jnp.sum(loss, keepdims=True)              # (1, 1)
        cnt_ref[...] = jnp.sum(valid.astype(jnp.float32), keepdims=True)

    return kernel


def cross_entropy_loss(logits, target, *, _max_tile_rows=None):
    """logits: (N, C, *spatial) float; target: (N, 1, *spatial) or (N, *spatial) int.

    Scalar mean cross-entropy over positions with target != -100 (weight=None,
    reduction='mean', ignore_index=-100 -- module defaults).  If every position
    is ignored the result is NaN (0/0), matching PyTorch.  Out-of-range
    non-ignore targets contribute logsumexp - 0 instead of raising.
    """
    x5, (n, c, p, h, w) = _view_5d(logits)
    # torch.squeeze(target, dim=1).long(); reshape is free (last two dims kept).
    t4 = target.reshape(n, p, h, w).astype(jnp.int32)

    tile_rows, vmem_limit = _pick_tile_rows(
        c, w, jnp.dtype(logits.dtype).itemsize, h, _max_tile_rows)
    n_row_tiles = pl.cdiv(h, tile_rows)
    grid = (n, p, n_row_tiles)

    sums, cnts = pl.pallas_call(
        _make_kernel(h, tile_rows),
        out_shape=(jax.ShapeDtypeStruct((n, p, n_row_tiles, 1, 1), jnp.float32),
                   jax.ShapeDtypeStruct((n, p, n_row_tiles, 1, 1), jnp.float32)),
        grid_spec=pltpu.PrefetchScalarGridSpec(
            num_scalar_prefetch=0,
            grid=grid,
            in_specs=[
                # (C, tile_rows, W): last two block dims are a multiple of 8
                # or the full dim, and W == full last dim -> always legal.
                pl.BlockSpec((None, c, None, tile_rows, w),
                             lambda i, q, j: (i, 0, q, j, 0)),
                pl.BlockSpec((None, None, tile_rows, w),
                             lambda i, q, j: (i, q, j, 0)),
            ],
            out_specs=[
                pl.BlockSpec((None, None, None, 1, 1),
                             lambda i, q, j: (i, q, j, 0, 0)),
                pl.BlockSpec((None, None, None, 1, 1),
                             lambda i, q, j: (i, q, j, 0, 0)),
            ],
        ),
        compiler_params=pltpu.CompilerParams(
            dimension_semantics=("parallel", "parallel", "parallel"),
            vmem_limit_bytes=vmem_limit,
        ),
    )(x5, t4)

    # Tiny epilogue in plain JAX: combine per-step partials into the mean.
    return jnp.sum(sums) / jnp.sum(cnts)


def _reference_loss(logits, target):
    """Pure-JAX reference mirroring torch.nn.CrossEntropyLoss defaults."""
    c = logits.shape[1]
    t = target.reshape(target.shape[0], -1).astype(jnp.int32).reshape(-1)
    x = jnp.moveaxis(logits, 1, -1).reshape(-1, c).astype(jnp.float32)
    lse = jax.scipy.special.logsumexp(x, axis=-1)
    tgt_logit = jnp.take_along_axis(
        x, jnp.clip(t, 0, c - 1)[:, None], axis=-1)[:, 0]
    valid = t != IGNORE_INDEX
    loss = jnp.where(valid, lse - tgt_logit, 0.0)
    return jnp.sum(loss) / jnp.sum(valid.astype(jnp.float32))


if __name__ == "__main__":
    key = jax.random.PRNGKey(0)
    (k_x, k_t, k_m, k_x2, k_t2,
     k_x3, k_t3, k_m3, k_x4, k_t4) = jax.random.split(key, 10)

    # Test 1: NCHW f32 logits, (N,1,H,W) int targets with some ignored.
    N, C, H, W = 2, 4, 16, 16
    x = jax.random.normal(k_x, (N, C, H, W), dtype=jnp.float32)
    t = jax.random.randint(k_t, (N, 1, H, W), 0, C, dtype=jnp.int32)
    ignore = jax.random.bernoulli(k_m, 0.1, (N, 1, H, W))
    t = jnp.where(ignore, jnp.int32(IGNORE_INDEX), t)
    loss = cross_entropy_loss(x, t)
    jax.block_until_ready(loss)
    ref = _reference_loss(x, t)
    assert jnp.allclose(loss, ref, rtol=1e-5, atol=1e-5), (loss, ref)

    # Test 2: bf16 logits, spatial dims not multiples of 8/128 (full-dim blocks).
    H2, W2 = 15, 15
    x2 = jax.random.normal(k_x2, (N, C, H2, W2), dtype=jnp.bfloat16)
    t2 = jax.random.randint(k_t2, (N, 1, H2, W2), 0, C, dtype=jnp.int32)
    loss2 = cross_entropy_loss(x2, t2)
    jax.block_until_ready(loss2)
    ref2 = _reference_loss(x2, t2)
    assert jnp.allclose(loss2, ref2, rtol=2e-3, atol=2e-3), (loss2, ref2)

    # Test 3: 3-D spatial volume, non-bitcastable middle dim (P path), forced
    # small row tile -> exercises the ragged last-row-tile mask.
    x3 = jax.random.normal(k_x3, (1, 3, 2, 12, 10), dtype=jnp.float32)
    t3 = jax.random.randint(k_t3, (1, 1, 2, 12, 10), 0, 3, dtype=jnp.int32)
    t3 = jnp.where(jax.random.bernoulli(k_m3, 0.15, t3.shape),
                   jnp.int32(IGNORE_INDEX), t3)
    loss3 = cross_entropy_loss(x3, t3, _max_tile_rows=8)
    jax.block_until_ready(loss3)
    ref3 = _reference_loss(x3, t3)
    assert jnp.allclose(loss3, ref3, rtol=1e-5, atol=1e-5), (loss3, ref3)

    # Test 4: 3-D spatial bf16 volume whose leading spatial dims merge into
    # ROWS as a bitcast (second-to-last dim % 16 == 0).
    x4 = jax.random.normal(k_x4, (2, 5, 8, 16, 16), dtype=jnp.bfloat16)
    t4 = jax.random.randint(k_t4, (2, 1, 8, 16, 16), 0, 5, dtype=jnp.int32)
    loss4 = cross_entropy_loss(x4, t4)
    jax.block_until_ready(loss4)
    ref4 = _reference_loss(x4, t4)
    assert jnp.allclose(loss4, ref4, rtol=2e-3, atol=2e-3), (loss4, ref4)

    print("KERNEL_OK")
</pallas_src>

<mosaic_0001>
module attributes {stable_mosaic.version = 11 : i64} {
  func.func @kernel(%arg0: i32, %arg1: i32, %arg2: i32, %arg3: memref<1x4x1x16x16xf32, #tpu.memory_space<vmem>>, %arg4: memref<1x1x16x16xi32, #tpu.memory_space<vmem>>, %arg5: memref<1x1x1x1x1xf32, #tpu.memory_space<vmem>>, %arg6: memref<1x1x1x1x1xf32, #tpu.memory_space<vmem>>) attributes {dimension_semantics = [#tpu.dimension_semantics<parallel>, #tpu.dimension_semantics<parallel>, #tpu.dimension_semantics<parallel>], iteration_bounds = array<i64: 2, 1, 1>, scalar_prefetch = 0 : i64, scratch_operands = 0 : i64, tpu.core_type = #tpu.core_type<tc>, window_params = [{transform_indices = @transform_0, window_bounds = array<i64: 1, 4, 1, 16, 16>}, {transform_indices = @transform_1, window_bounds = array<i64: 1, 1, 16, 16>}, {transform_indices = @transform_2, window_bounds = array<i64: 1, 1, 1, 1, 1>}, {transform_indices = @transform_3, window_bounds = array<i64: 1, 1, 1, 1, 1>}]} {
    %c0 = arith.constant 0 : index
    %c0_0 = arith.constant 0 : index
    %c0_1 = arith.constant 0 : index
    %c0_2 = arith.constant 0 : index
    %c0_3 = arith.constant 0 : index
    %0 = vector.load %arg3[%c0, %c0_0, %c0_1, %c0_2, %c0_3] : memref<1x4x1x16x16xf32, #tpu.memory_space<vmem>>, vector<1x4x1x16x16xf32>
    %1 = vector.shape_cast %0 : vector<1x4x1x16x16xf32> to vector<4x16x16xf32>
    %c0_4 = arith.constant 0 : index
    %c0_5 = arith.constant 0 : index
    %c0_6 = arith.constant 0 : index
    %c0_7 = arith.constant 0 : index
    %2 = vector.load %arg4[%c0_4, %c0_5, %c0_6, %c0_7] : memref<1x1x16x16xi32, #tpu.memory_space<vmem>>, vector<1x1x16x16xi32>
    %3 = vector.shape_cast %2 : vector<1x1x16x16xi32> to vector<16x16xi32>
    %c-100_i32 = arith.constant -100 : i32
    %4 = vector.broadcast %c-100_i32 : i32 to vector<16x16xi32>
    %5 = arith.cmpi ne, %3, %4 : vector<16x16xi32>
    %cst = arith.constant dense<0xFF800000> : vector<16x16xf32>
    %6 = vector.multi_reduction <maximumf>, %1, %cst [0] : vector<4x16x16xf32> to vector<16x16xf32>
    %7 = tpu.iota {dimensions = array<i32: 0>} : vector<4x16x16xi32>
    %8 = vector.shape_cast %3 : vector<16x16xi32> to vector<1x16x16xi32>
    %9 = vector.broadcast %8 : vector<1x16x16xi32> to vector<4x16x16xi32>
    %10 = arith.cmpi eq, %7, %9 : vector<4x16x16xi32>
    %c0_i32 = arith.constant 0 : i32
    %11 = arith.sitofp %c0_i32 : i32 to f32
    %12 = vector.broadcast %11 : f32 to vector<4x16x16xf32>
    %13 = arith.select %10, %1, %12 : vector<4x16x16xi1>, vector<4x16x16xf32>
    %cst_8 = arith.constant dense<0.000000e+00> : vector<16x16xf32>
    %14 = vector.multi_reduction <add>, %13, %cst_8 [0] : vector<4x16x16xf32> to vector<16x16xf32>
    %15 = vector.shape_cast %6 : vector<16x16xf32> to vector<1x16x16xf32>
    %16 = vector.broadcast %15 : vector<1x16x16xf32> to vector<4x16x16xf32>
    %17 = arith.subf %1, %16 : vector<4x16x16xf32>
    %18 = math.exp %17 : vector<4x16x16xf32>
    %cst_9 = arith.constant dense<0.000000e+00> : vector<16x16xf32>
    %19 = vector.multi_reduction <add>, %18, %cst_9 [0] : vector<4x16x16xf32> to vector<16x16xf32>
    %20 = math.log %19 : vector<16x16xf32>
    %21 = arith.addf %20, %6 : vector<16x16xf32>
    %22 = arith.subf %21, %14 : vector<16x16xf32>
    %cst_10 = arith.constant 0.000000e+00 : f32
    %23 = vector.broadcast %cst_10 : f32 to vector<16x16xf32>
    %24 = arith.select %5, %22, %23 : vector<16x16xi1>, vector<16x16xf32>
    %25 = vector.shape_cast %24 : vector<16x16xf32> to vector<1x16x16xf32>
    %cst_11 = arith.constant dense<0.000000e+00> : vector<1xf32>
    %26 = vector.multi_reduction <add>, %25, %cst_11 [1, 2] : vector<1x16x16xf32> to vector<1xf32>
    %27 = vector.shape_cast %26 : vector<1xf32> to vector<1x1x1xf32>
    %28 = vector.extract %27[0, 0, 0] : f32 from vector<1x1x1xf32>
    %29 = vector.broadcast %28 : f32 to vector<1x1xf32>
    %c0_12 = arith.constant 0 : index
    %c0_13 = arith.constant 0 : index
    %c0_14 = arith.constant 0 : index
    %c0_15 = arith.constant 0 : index
    %c0_16 = arith.constant 0 : index
    %30 = vector.load %arg5[%c0_12, %c0_13, %c0_14, %c0_15, %c0_16] : memref<1x1x1x1x1xf32, #tpu.memory_space<vmem>>, vector<1x1x1x1x1xf32>
    %31 = vector.shape_cast %30 : vector<1x1x1x1x1xf32> to vector<1x1xf32>
    %32 = vector.shape_cast %29 : vector<1x1xf32> to vector<1x1x1x1x1xf32>
    tpu.vector_store %arg5[%c0_12, %c0_13, %c0_14, %c0_15, %c0_16], %32 {strides = array<i32>} : memref<1x1x1x1x1xf32, #tpu.memory_space<vmem>>, vector<1x1x1x1x1xf32>,
    %33 = arith.extui %5 : vector<16x16xi1> to vector<16x16xi32>
    %34 = arith.sitofp %33 : vector<16x16xi32> to vector<16x16xf32>
    %35 = vector.shape_cast %34 : vector<16x16xf32> to vector<1x16x16xf32>
    %cst_17 = arith.constant dense<0.000000e+00> : vector<1xf32>
    %36 = vector.multi_reduction <add>, %35, %cst_17 [1, 2] : vector<1x16x16xf32> to vector<1xf32>
    %37 = vector.shape_cast %36 : vector<1xf32> to vector<1x1x1xf32>
    %38 = vector.extract %37[0, 0, 0] : f32 from vector<1x1x1xf32>
    %39 = vector.broadcast %38 : f32 to vector<1x1xf32>
    %c0_18 = arith.constant 0 : index
    %c0_19 = arith.constant 0 : index
    %c0_20 = arith.constant 0 : index
    %c0_21 = arith.constant 0 : index
    %c0_22 = arith.constant 0 : index
    %40 = vector.load %arg6[%c0_18, %c0_19, %c0_20, %c0_21, %c0_22] : memref<1x1x1x1x1xf32, #tpu.memory_space<vmem>>, vector<1x1x1x1x1xf32>
    %41 = vector.shape_cast %40 : vector<1x1x1x1x1xf32> to vector<1x1xf32>
    %42 = vector.shape_cast %39 : vector<1x1xf32> to vector<1x1x1x1x1xf32>
    tpu.vector_store %arg6[%c0_18, %c0_19, %c0_20, %c0_21, %c0_22], %42 {strides = array<i32>} : memref<1x1x1x1x1xf32, #tpu.memory_space<vmem>>, vector<1x1x1x1x1xf32>,
    return
  }
  func.func @transform_0(%arg0: i32, %arg1: i32, %arg2: i32) -> (i32, i32, i32, i32, i32) {
    %c0_i32 = arith.constant 0 : i32
    %c0_i32_0 = arith.constant 0 : i32
    %c0_i32_1 = arith.constant 0 : i32
    return %arg0, %c0_i32, %arg1, %arg2, %c0_i32_0 : i32, i32, i32, i32, i32
  }
  func.func @transform_1(%arg0: i32, %arg1: i32, %arg2: i32) -> (i32, i32, i32, i32) {
    %c0_i32 = arith.constant 0 : i32
    %c0_i32_0 = arith.constant 0 : i32
    return %arg0, %arg1, %arg2, %c0_i32 : i32, i32, i32, i32
  }
  func.func @transform_2(%arg0: i32, %arg1: i32, %arg2: i32) -> (i32, i32, i32, i32, i32) {
    %c0_i32 = arith.constant 0 : i32
    %c0_i32_0 = arith.constant 0 : i32
    %c0_i32_1 = arith.constant 0 : i32
    return %arg0, %arg1, %arg2, %c0_i32, %c0_i32_0 : i32, i32, i32, i32, i32
  }
  func.func @transform_3(%arg0: i32, %arg1: i32, %arg2: i32) -> (i32, i32, i32, i32, i32) {
    %c0_i32 = arith.constant 0 : i32
    %c0_i32_0 = arith.constant 0 : i32
    %c0_i32_1 = arith.constant 0 : i32
    return %arg0, %arg1, %arg2, %c0_i32, %c0_i32_0 : i32, i32, i32, i32, i32
  }
}

</mosaic_0001>

<bundles_post_ra>
// kernel: tpu_custom_call.1
= control target key start
LH: loop header
LB: loop body
LE: loop exit
PB: predicated region body
PF: predicated region fallthrough
CT: control target
= control target key end

     0   :  { %9 = vsyncpa [#allocation3], 0  ;;  %s1141_s0 = inlined_call_operand.hbm [shape: f32[2,4,1,16,16], index: 0, kind: input, shape index: {}]   ;;  %s1142_s1 = inlined_call_operand.hbm [shape: s32[2,1,16,16], index: 1, kind: input, shape index: {}]   ;;  %s1143_s2 = inlined_call_operand.vmem [shape: f32[2,1,1,1,1], index: 2, kind: output, shape index: {0}]   ;;  %s1144_s3 = inlined_call_operand.vmem [shape: f32[2,1,1,1,1], index: 3, kind: output, shape index: {1}]  }
   0x1   :  { %11 = vsyncpa [#allocation3 + $0x1], 0 }
   0x2   :  { %12 = vsyncpa [#allocation5], 0 }
   0x3   :  { %14 = vsyncpa [#allocation5 + $0x1], 0  ;;  %s858_s12 = smov 0   ;;  %s860_s13 = smov 0  }
   0x4   :  { %s862_s14 = smov 0   ;;  %s864_s15 = smov 0  }
   0x5   :  { %s866_s16 = smov 0   ;;  %s868_s17 = smov 0  }
   0x6 LB: > { %s611_s18 = sadd.s32 4294967295, %s831_s17   ;;  %s39_s19 = sadd.s32 1, %s827_s16  ;;  %s831_s17 = sphi %s868_s17, %s20_s17   ;;  %s827_s16 = sphi %s866_s16, %s1155_s16   ;;  %s823_s15 = sphi %s864_s15, %s1154_s15   ;;  %s819_s14 = sphi %s862_s14, %s1153_s14   ;;  %s815_s13 = sphi %s860_s13, %s1152_s13   ;;  %s811_s12 = sphi %s858_s12, %s1151_s12  }
   0x7   : > { %p41_p0 = scmp.ge.s32.totalorder %s39_s19, 2  ;;  %s50_s20 = sadd.s32 1, %s819_s14 }
   0x8   : > { %p57_p1 = scmp.ne.s32.totalorder %s819_s14, %s815_s13  ;;  %p58_p2 = scmp.eq.s32.totalorder %s831_s17, 0 }
   0x9   : > { %s1157_s19 = smov (%p41_p0, %s39_s19), 0  ;;  %p63_p4 = scmp.ne.s32.totalorder %s815_s13, %s811_s12 }
   0xa   : > { %p894_p3 = por %p58_p2, %p57_p1  ;;  %s43_s22 = ssub.s32 %s827_s16, %s1157_s19 }
   0xb   : > { %p64_p5 = scmp.eq.s32.totalorder %s611_s18, 0  ;;  %p48_p6 = scmp.eq.s32.totalorder %s43_s22, 0 }
   0xc   : > { %p645_p8 = scmp.lt.s32.totalorder %s831_s17, 2  ;;  %s910_s25 = sand.u32 1, %s819_s14  }
   0xd   : > { %p901_p7 = por %p64_p5, %p63_p4  ;;  %s628_s26 = sshll.u32 %s827_s16, 10 }
   0xe   : > { %s907_s24 = scalar_select %p48_p6, %s819_s14, %s50_s20  }
   0xf   : > { %s1147_s23 = scalar_select %p901_p7, 1, 0 }
  0x10   : > { %s615_s27 = sshll.u32 %s910_s25, 6  ;;  %s917_s30 = scalar_lea.hbm %s1141_s0, %s628_s26 }
  0x11   : > { %s181_s4 = scalar_lea.vmem [#allocation2], %s615_s27  ;;  %p921_p9 = pnand %p645_p8, %p894_p3 }
  0x12   : > { %s192_s5 = sshll.u32 %s181_s4, 4  ;;  %s178_s7 = scalar_lea.sflag [#allocation3], %s910_s25  ;;  %s925_s5 = int_to_ptr.vmem [resolvable:$true] %s192_s5 }
  0x13   : > { %s717_s8 = scalar_lea.hbm %s917_s30, 1024  ;;  %p719_p11 = pneg %p921_p9 }
  0x14   : > { %p718_p10 = scmp.ne.s32.totalorder %s917_s30, %s717_s8  ;;  %s722_s11 = scalar_lea.hbm %s1141_s0, 2048 }
  0x15   : > { %p723_p0 = scmp.lt.u32.totalorder %s917_s30, %s1141_s0  ;;  %p724_p1 = scmp.lt.u32.totalorder %s722_s11, %s717_s8 }
  0x16   : > { %p720_p12 = pnand %p719_p11, %p718_p10  ;;  %p726_p3 = scmp.lt.u32.totalorder %s717_s8, %s917_s30 }
  0x17   : > { %p725_p2 = por %p724_p1, %p723_p0 }
  0x18   : > { %p721_p13 = pneg %p720_p12 }
  0x19   : > { %p727_p4 = por %p726_p3, %p725_p2 }
  0x1b   : > { %p728_p5 = pnand %p727_p4, %p721_p13 }
  0x1d   : > { %731 = shalt.err (!%p728_p5)
}
  0x1e   : > { %s732_s20 = scalar_lea.vmem %s925_s5, 1024  ;;  %s833_s21 = smov [#allocation2]  }
  0x1f   : > { %p733_p6 = scmp.ne.s32.totalorder %s925_s5, %s732_s20  ;;  %s737_s22 = sshll.u32 %s833_s21, 4  ;;  %s738_s22 = int_to_ptr.vmem [resolvable:$false] %s737_s22 }
  0x20   : > { %s739_s26 = scalar_lea.vmem %s738_s22, 2048  ;;  %p740_p12 = scmp.lt.s32.totalorder %s925_s5, %s738_s22 }
  0x21   : > { %p735_p8 = pnand %p733_p6, %p719_p11  ;;  %p741_p0 = scmp.lt.s32.totalorder %s739_s26, %s732_s20 }
  0x23   : > { %p736_p10 = pneg %p735_p8  ;;  %p742_p1 = por %p741_p0, %p740_p12 }
  0x25   : > { %p743_p2 = pnand %p742_p1, %p736_p10 }
  0x27   : > { %746 = shalt.err (!%p743_p2)
}
  0x28   : > { %s834_s27 = smov 128   ;;  %s835_s28 = smov 8  }
  0x29   : > { %641 = dma.hbm_to_vmem [thread:$0]  (!%p921_p9), %s917_s30, 1024, %s925_s5, %s178_s7, %s834_s27, %s834_s27, %s835_s28  }
  0x2a   : > { %p621_p13 = scmp.ge.s32.totalorder %s831_s17, 1  ;;  %p225_p3 = scmp.lt.s32.totalorder %s831_s17, 3 }
  0x2b   : > { %s618_s29 = sshll.u32 %s910_s25, 4  ;;  %s629_s8 = sshll.u32 %s827_s16, 8 }
  0x2c   : > { %p961_p4 = pnand %p621_p13, %p225_p3  ;;  %s206_s9 = scalar_lea.vmem [#allocation4], %s618_s29 }
  0x2d   : > { %s217_s10 = sshll.u32 %s206_s9, 4  ;;  %s969_s18 = scalar_lea.hbm %s1142_s1, %s629_s8  ;;  %s971_s10 = int_to_ptr.vmem [resolvable:$true] %s217_s10 }
  0x2e   : > { %s203_s30 = scalar_lea.sflag [#allocation5], %s910_s25  ;;  %s747_s5 = scalar_lea.hbm %s969_s18, 256 }
  0x2f   : > { %p748_p5 = scmp.ne.s32.totalorder %s969_s18, %s747_s5  ;;  %s752_s21 = scalar_lea.hbm %s1142_s1, 512 }
  0x30   : > { %p753_p10 = scmp.lt.u32.totalorder %s969_s18, %s1142_s1  ;;  %p754_p12 = scmp.lt.u32.totalorder %s752_s21, %s747_s5 }
  0x31   : > { %p750_p6 = pnand %p748_p5, %p719_p11  ;;  %p756_p1 = scmp.lt.u32.totalorder %s747_s5, %s969_s18 }
  0x32   : > { %p755_p0 = por %p754_p12, %p753_p10 }
  0x33   : > { %p751_p8 = pneg %p750_p6 }
  0x34   : > { %p757_p2 = por %p756_p1, %p755_p0 }
  0x36   : > { %p758_p13 = pnand %p757_p2, %p751_p8 }
  0x38   : > { %761 = shalt.err (!%p758_p13)
}
  0x39   : > { %s762_s29 = scalar_lea.vmem %s971_s10, 256  ;;  %s836_s8 = smov [#allocation4]  }
  0x3a   : > { %p763_p3 = scmp.ne.s32.totalorder %s971_s10, %s762_s29  ;;  %s767_s9 = sshll.u32 %s836_s8, 4  ;;  %s768_s9 = int_to_ptr.vmem [resolvable:$false] %s767_s9 }
  0x3b   : > { %s769_s11 = scalar_lea.vmem %s768_s9, 512  ;;  %p770_p7 = scmp.lt.s32.totalorder %s971_s10, %s768_s9 }
  0x3c   : > { %p765_p5 = pnand %p763_p3, %p719_p11  ;;  %p771_p10 = scmp.lt.s32.totalorder %s769_s11, %s762_s29 }
  0x3e   : > { %p766_p6 = pneg %p765_p5  ;;  %p772_p12 = por %p771_p10, %p770_p7 }
  0x40   : > { %p773_p0 = pnand %p772_p12, %p766_p6 }
  0x42   : > { %776 = shalt.err (!%p773_p0)
}
  0x43   : > { %644 = dma.hbm_to_vmem [thread:$0]  (!%p921_p9), %s969_s18, 256, %s971_s10, %s203_s30, %s834_s27, %s834_s27, %s835_s28  }
  0x44   : > { %229 = sbr.rel (%p961_p4) target bundleno = 343 (0x157), region = 28  ;;  %s231_s12 = sand.u32 (!%p961_p4), 1, %s815_s13  }
  0x45   : > { %s622_s5 = sshll.u32 (!%p961_p4), %s231_s12, 6  ;;  %s232_s7 = scalar_lea.sflag (!%p961_p4), [#allocation3], %s231_s12 }
  0x46   : > { %s235_s20 = scalar_lea.vmem (!%p961_p4), [#allocation2], %s622_s5  ;;  %p1150_p7 = scmp.ne.s32.totalorder (!%p961_p4), %s1147_s23, 0 }
  0x4b   : > { %802 = dma.done.wait (%p1150_p7), %s232_s7, 1024  }
  0x4c   : > { %804 = vsyncadd (%p1150_p7), %s232_s7, 4294966272  ;;  %s623_s6 = sshll.u32 %s231_s12, 4  ;;  %s241_s25 = scalar_lea.sflag [#allocation5], %s231_s12 }
  0x4d   : > { %s1009_s21 = scalar_lea.vmem [#allocation4], %s623_s6 }
  0x4e   : > { %806 = dma.done.wait (%p1150_p7), %s241_s25, 256  }
  0x4f   : > { %808 = vsyncadd (%p1150_p7), %s241_s25, 4294967040  ;;  %vm317_vm0 = vcmask 130048   ;;  %v1015_v0 = vld [vmem:[%s235_s20] sm:$0xff]  ;;  %v1017_v1 = vld [vmem:[%s235_s20 + $0x8] sm:$0xff]  ;;  %p287_p9 = scmp.lt.s32.totalorder %s823_s15, 1  ;;  %vm423_vm11 = vcmask 0  }
  0x50   : > { %v1019_v2 = vld [vmem:[%s235_s20 + $0x10] sm:$0xff]  ;;  %v1021_v3 = vld [vmem:[%s235_s20 + $0x18] sm:$0xff]  ;;  %v1023_v4 = vld [vmem:[%s235_s20 + $0x20] sm:$0xff]  ;;  %v318_v6 = vsel %vm317_vm0, %v1015_v0, -inf  ;;  %v325_v8 = vsel %vm317_vm0, %v1017_v1, -inf }
  0x51   : > { %v1025_v5 = vld [vmem:[%s235_s20 + $0x28] sm:$0xff]  ;;  %v319_v7 = vsel %vm317_vm0, %v1019_v2, -inf  ;;  %v1033_v9 = vld [vmem:[%s235_s20 + $0x30] sm:$0xff]  ;;  %v1035_v10 = vld [vmem:[%s235_s20 + $0x38] sm:$0xff]  ;;  %v320_v11 = vsel %vm317_vm0, %v1023_v4, -inf  ;;  %v326_v12 = vsel %vm317_vm0, %v1021_v3, -inf }
  0x52   : > { %v327_v13 = vsel %vm317_vm0, %v1025_v5, -inf  ;;  %v321_v14 = vmax.f32 %v318_v6, %v320_v11  ;;  %v322_v15 = vsel %vm317_vm0, %v1033_v9, -inf  ;;  %v329_v18 = vsel %vm317_vm0, %v1035_v10, -inf  ;;  %v1068_v40 = vld [vmem:[%s1009_s21] sm:$0xff]  ;;  %v1072_v43 = vld [vmem:[%s1009_s21 + $0x8] sm:$0xff]  ;;  %s1159_s15 = smov (!%p287_p9, %s823_s15), 1 }
  0x53   : > { %v323_v16 = vmax.f32 %v319_v7, %v322_v15  ;;  %v328_v17 = vmax.f32 %v325_v8, %v327_v13  ;;  %v330_v19 = vmax.f32 %v326_v12, %v329_v18  ;;  %vm332_vm1 = vcmp.eq.s32.totalorder %v1068_v40, 0  ;;  %s295_s28 = scalar_lea.vmem %s1143_s2, %s1159_s15  ;;  %s304_s30 = scalar_lea.vmem %s1144_s3, %s1159_s15 }
  0x54   : > { %vm334_vm2 = vcmp.eq.s32.totalorder %v1068_v40, 1  ;;  %vm333_vm3 = vcmp.eq.s32.totalorder %v1072_v43, 0  ;;  %vm335_vm4 = vcmp.eq.s32.totalorder %v1072_v43, 1  ;;  %vm336_vm5 = vcmp.eq.s32.totalorder %v1068_v40, 2 }
  0x55   : > { %v1047_v20 = vmax.f32 %v321_v14, %v323_v16  ;;  %v1049_v21 = vmax.f32 %v328_v17, %v330_v19  ;;  %v340_v57 = vsel %vm332_vm1, %v1015_v0, 0.0  ;;  %v342_v58 = vsel %vm334_vm2, %v1019_v2, 0.0 }
  0x56   : > { %v341_v61 = vsel %vm333_vm3, %v1017_v1, 0.0  ;;  %v343_v62 = vsel %vm335_vm4, %v1021_v3, 0.0  ;;  %vm337_vm6 = vcmp.eq.s32.totalorder %v1072_v43, 2  ;;  %v348_v8 = vsel %vm317_vm0, %v340_v57, 0.0 }
  0x57   : > { %v362_v22 = vsub.f32 %v1015_v0, %v1047_v20  ;;  %v363_v23 = vsub.f32 %v1017_v1, %v1049_v21  ;;  %v364_v24 = vsub.f32 %v1019_v2, %v1047_v20  ;;  %v365_v25 = vsub.f32 %v1021_v3, %v1049_v21 }
  0x58   : > { %v366_v26 = vsub.f32 %v1023_v4, %v1047_v20  ;;  %v367_v27 = vsub.f32 %v1025_v5, %v1049_v21  ;;  %v368_v28 = vsub.f32 %v1033_v9, %v1047_v20  ;;  %v369_v30 = vsub.f32 %v1035_v10, %v1049_v21 }
  0x59   : > { %v370_v29 = vmul.f32 1.442695, %v362_v22  ;;  %v372_v31 = vmul.f32 1.442695, %v363_v23  ;;  %v374_v32 = vmul.f32 1.442695, %v364_v24 }
  0x5a   : > { %v376_v33 = vmul.f32 1.442695, %v365_v25  ;;  %v378_v34 = vmul.f32 1.442695, %v366_v26  ;;  %v380_v35 = vmul.f32 1.442695, %v367_v27 }
  0x5b   : > { %697 = vpow2.f32 %v370_v29  ;;  %v382_v36 = vmul.f32 1.442695, %v368_v28  ;;  %v384_v37 = vmul.f32 1.442695, %v369_v30  ;;  %v349_v11 = vsel %vm317_vm0, %v342_v58, 0.0 }
  0x5c   : > { %699 = vpow2.f32 %v372_v31  ;;  %v344_v0 = vsel %vm336_vm5, %v1023_v4, 0.0  ;;  %v355_v2 = vsel %vm317_vm0, %v341_v61, 0.0  ;;  %v356_v1 = vsel %vm317_vm0, %v343_v62, 0.0 }
  0x5d   : > { %701 = vpow2.f32 %v374_v32  ;;  %vm338_vm7 = vcmp.eq.s32.totalorder %v1068_v40, 3  ;;  %v345_v3 = vsel %vm337_vm6, %v1025_v5, 0.0  ;;  %vm339_vm8 = vcmp.eq.s32.totalorder %v1072_v43, 3 }
  0x5e   : > { %703 = vpow2.f32 %v376_v33  ;;  %v350_v12 = vadd.f32 %v349_v11, %v348_v8  ;;  %v351_v13 = vsel %vm317_vm0, %v344_v0, 0.0  ;;  %v357_v14 = vadd.f32 %v356_v1, %v355_v2 }
  0x5f   : > { %705 = vpow2.f32 %v378_v34  ;;  %v346_v15 = vsel %vm338_vm7, %v1033_v9, 0.0  ;;  %v358_v16 = vsel %vm317_vm0, %v345_v3, 0.0  ;;  %v347_v4 = vsel %vm339_vm8, %v1035_v10, 0.0 }
  0x60   : > { %707 = vpow2.f32 %v380_v35  ;;  %v352_v17 = vadd.f32 %v351_v13, %v350_v12  ;;  %v353_v18 = vsel %vm317_vm0, %v346_v15, 0.0  ;;  %v359_v19 = vadd.f32 %v358_v16, %v357_v14 }
  0x61   : > { %709 = vpow2.f32 %v382_v36  ;;  %v360_v22 = vsel %vm317_vm0, %v347_v4, 0.0  ;;  %vm315_vm9 = vcmp.ne.s32.totalorder %v1068_v40, 4294967196  ;;  %vm316_vm10 = vcmp.ne.s32.totalorder %v1072_v43, 4294967196 }
  0x62   : > { %711 = vpow2.f32 %v384_v37  ;;  %v354_v24 = vadd.f32 %v353_v18, %v352_v17  ;;  %v361_v26 = vadd.f32 %v360_v22, %v359_v19  ;;  %v837_v30 = vmov 0.0  }
  0x63   : > { %v624_v31 = vsel %vm315_vm9, 1.0, %v837_v30  ;;  %v625_v32 = vsel %vm316_vm10, 1.0, %v837_v30 }
  0x64   : > { %v429_v37 = vsel %vm317_vm0, %v624_v31, 0.0 }
  0x65   : > { %v698_v38 = vpop.eup %697 }
  0x66   : > { %v700_v39 = vpop.eup %699  ;;  %v386_v41 = vsel %vm317_vm0, %v698_v38, 0.0 }
  0x67   : > { %v702_v42 = vpop.eup %701  ;;  %v393_v44 = vsel %vm317_vm0, %v700_v39, 0.0 }
  0x68   : > { %v704_v45 = vpop.eup %703  ;;  %v387_v46 = vsel %vm317_vm0, %v702_v42, 0.0 }
  0x69   : > { %v706_v47 = vpop.eup %705  ;;  %v388_v48 = vadd.f32 %v387_v46, %v386_v41  ;;  %v394_v49 = vsel %vm317_vm0, %v704_v45, 0.0 }
  0x6a   : > { %v708_v50 = vpop.eup %707  ;;  %v389_v51 = vsel %vm317_vm0, %v706_v47, 0.0  ;;  %v395_v52 = vadd.f32 %v394_v49, %v393_v44 }
  0x6b   : > { %v710_v53 = vpop.eup %709  ;;  %v390_v54 = vadd.f32 %v389_v51, %v388_v48  ;;  %v396_v55 = vsel %vm317_vm0, %v708_v50, 0.0 }
  0x6c   : > { %v712_v56 = vpop.eup %711  ;;  %v391_v59 = vsel %vm317_vm0, %v710_v53, 0.0  ;;  %v397_v60 = vadd.f32 %v396_v55, %v395_v52 }
  0x6d   : > { %v392_v63 = vadd.f32 %v391_v59, %v390_v54  ;;  %v398_v6 = vsel %vm317_vm0, %v712_v56, 0.0 }
  0x6e   : > { %v399_v7 = vadd.f32 %v398_v6, %v397_v60 }
  0x6f   : > { %713 = vlog2.f32 %v392_v63 }
  0x70   : > { %715 = vlog2.f32 %v399_v7 }
  0x79   : > { %v714_v23 = vpop.eup %713 }
  0x7a   : > { %v716_v5 = vpop.eup %715  ;;  %v401_v25 = vmul.f32 0.6931472, %v714_v23 }
  0x7b   : > { %v403_v27 = vmul.f32 0.6931472, %v716_v5 }
  0x7c   : > { %v404_v28 = vadd.f32 %v401_v25, %v1047_v20  ;;  %v430_v20 = vsel %vm317_vm0, %v625_v32, 0.0 }
  0x7d   : > { %v405_v9 = vadd.f32 %v403_v27, %v1049_v21  ;;  %v431_v21 = vadd.f32 %v430_v20, %v429_v37 }
  0x7e   : > { %v406_v10 = vsub.f32 %v404_v28, %v354_v24 }
  0x7f   : > { %v407_v29 = vsub.f32 %v405_v9, %v361_v26 }
  0x80   : > { %v408_v33 = vsel %vm315_vm9, %v406_v10, 0.0 }
  0x81   : > { %v409_v34 = vsel %vm316_vm10, %v407_v29, 0.0  ;;  %v410_v35 = vsel %vm317_vm0, %v408_v33, 0.0 }
  0x82   : > { %v411_v36 = vsel %vm317_vm0, %v409_v34, 0.0 }
  0x83   : > { %v412_v38 = vadd.f32 %v411_v36, %v410_v35 }
  0x85   : > { %413 = vadd.xlane.f32.xlu0 %v412_v38 }
  0x89   : > { %432 = vadd.xlane.f32.xlu0 %v431_v21 }
 0x112   : > { %v414_v39 = vpop.xlane.xlu0 %413 }
 0x113   : > { %v415_v40 = vrot.slane %v414_v39, 4 }
 0x115   : > { %v416_v41 = vadd.f32 %v415_v40, %v414_v39 }
 0x116   : > { %v433_v42 = vpop.xlane.xlu0 %432 }
 0x117   : > { %v417_v43 = vrot.slane %v416_v41, 2  ;;  %v434_v44 = vrot.slane %v433_v42, 4 }
 0x119   : > { %v435_v45 = vadd.f32 %v434_v44, %v433_v42  ;;  %v418_v46 = vadd.f32 %v417_v43, %v416_v41 }
 0x11b   : > { %v436_v47 = vrot.slane %v435_v45, 2  ;;  %v419_v48 = vrot.slane %v418_v46, 1 }
 0x11d   : > { %v437_v49 = vadd.f32 %v436_v47, %v435_v45  ;;  %v420_v50 = vadd.f32 %v419_v48, %v418_v46 }
 0x11f   : > { %630 = vpush %v420_v50  ;;  %v438_v51 = vrot.slane %v437_v49, 1 }
 0x121   : > { %v439_v52 = vadd.f32 %v438_v51, %v437_v49 }
 0x123   : > { %632 = vpush %v439_v52 }
 0x150   : > { %s631_s4 = spop %630 }
 0x151   : > { %v422_v53 = vstv %s631_s4 }
 0x152   : > { %424 = vst.msk [vmem:[%s295_s28] sm:$0x1] %vm423_vm11, %v422_v53 }
 0x154   : > { %s633_s22 = spop %632 }
 0x155   : > { %v441_v54 = vstv %s633_s22 }
 0x156   : > { %442 = vst.msk [vmem:[%s304_s30] sm:$0x1] %vm423_vm11, %v441_v54 }
 0x157 PF: > { %s20_s17 = sadd.s32 1, %s831_s17   ;;  %s1151_s12 = smov %s815_s13 }
 0x158   : > { %p17_p11 = scmp.ge.s32.totalorder %s20_s17, 4   ;;  %s1152_s13 = smov %s819_s14 }
 0x159   : > { %s1153_s14 = smov %s907_s24  ;;  %s1154_s15 = smov %s827_s16 }
 0x15a   : > { %s1155_s16 = smov %s1157_s19  ;;  %19 = sbr.rel (!%p17_p11) target bundleno = 6 (0x6), region = 93 }
 0x161   :  { %496 = vsyncpa [#allocation3], 1 }
 0x162   :  { %498 = vsyncpa [#allocation3 + $0x1], 1 }
 0x163   :  { %499 = vsyncpa [#allocation5], 1 }
 0x164   :  { %501 = vsyncpa [#allocation5 + $0x1], 1 }

</bundles_post_ra>
